<compile_context>
chip_gen: v6e
topology: v6e:2x2x1
jax: 0.10.0
libtpu: 0.0.40
codegen_flags: <defaults>
</compile_context>

<pallas_src>
import jax
import jax.numpy as jnp
from jax.experimental import pallas as pl
from jax.experimental.pallas import tpu as pltpu

OUT_DIM = 8  # module default


def time2vec_kernel(t_ref, w_ref, b_ref, out_ref):
    # t_ref:   (TB, S)     timestamps for TB batch rows (seq on lanes)
    # w_ref:   (D, 1)      [w0, W_0..W_{D-2}] as a column
    # b_ref:   (D, 1)      [b0, phi_0..phi_{D-2}] as a column
    # out_ref: (TB, D, S)  lane-dense output (channels on sublanes)
    t = t_ref[...]                                         # (TB, S)
    w = w_ref[...][None, :, :]                             # (1, D, 1)
    b = b_ref[...][None, :, :]                             # (1, D, 1)
    full = t[:, None, :] * w + b                           # (TB, D, S) one MAC
    # sin everything (EUP), then select channel 0 back to the linear value.
    ch = jax.lax.broadcasted_iota(jnp.int32, full.shape, dimension=1)
    out_ref[...] = jnp.where(ch == 0, full, jnp.sin(full))


def _pick_block_rows(B, S, D):
    """Rows per grid step: whole array if tiny, else ~1 MiB, multiple of 8."""
    rows_per_mib = max(1, (1 << 20) // (S * D * 4))
    if B <= rows_per_mib:
        return B                          # single block; no per-step overhead
    return max(8, (rows_per_mib // 8) * 8)  # sublane-aligned multi-row tiles


def time2vec(t, w0, b0, W, phi):
    """t: (B, S) float32 -> (B, S, OUT_DIM) float32."""
    B, S = t.shape
    D = OUT_DIM
    t = t.astype(jnp.float32)
    w_col = jnp.concatenate([w0, W]).astype(jnp.float32).reshape(D, 1)
    b_col = jnp.concatenate([b0, phi]).astype(jnp.float32).reshape(D, 1)

    tb = _pick_block_rows(B, S, D)
    grid = (pl.cdiv(B, tb),)

    out_bds = pl.pallas_call(
        time2vec_kernel,
        out_shape=jax.ShapeDtypeStruct((B, D, S), jnp.float32),
        grid=grid,
        in_specs=[
            pl.BlockSpec((tb, S), lambda i: (i, 0)),
            pl.BlockSpec((D, 1), lambda i: (0, 0)),   # constant -> stays resident
            pl.BlockSpec((D, 1), lambda i: (0, 0)),
        ],
        out_specs=pl.BlockSpec((tb, D, S), lambda i: (i, 0, 0)),
        compiler_params=pltpu.CompilerParams(
            dimension_semantics=("parallel",)),
        cost_estimate=pl.CostEstimate(
            flops=2 * B * S * D,
            transcendentals=B * S * D,
            bytes_accessed=4 * B * S * (1 + D)),
    )(t, w_col, b_col)

    # Layout plumbing only: (B, D, S) -> (B, S, D) to match the PyTorch module.
    return jnp.transpose(out_bds, (0, 2, 1))


def time2vec_ref(t, w0, b0, W, phi):
    lin = w0 * t + b0
    per = jnp.sin(t[..., None] * W + phi)
    return jnp.concatenate([lin[..., None], per], axis=-1)


if __name__ == "__main__":
    # Deterministic synthetic parameters (module's __init__ uses randn).
    k0, k1, k2, k3, k4 = jax.random.split(jax.random.PRNGKey(0), 5)
    w0 = jax.random.normal(k0, (1,), dtype=jnp.float32)
    b0 = jax.random.normal(k1, (1,), dtype=jnp.float32)
    W = jax.random.normal(k2, (OUT_DIM - 1,), dtype=jnp.float32)
    phi = jax.random.normal(k3, (OUT_DIM - 1,), dtype=jnp.float32)

    # Deterministic input timestamps.
    B, S = 4, 128
    t = jax.random.normal(k4, (B, S), dtype=jnp.float32)

    out = jax.block_until_ready(time2vec(t, w0, b0, W, phi))
    ref = time2vec_ref(t, w0, b0, W, phi)

    assert out.shape == (B, S, OUT_DIM)
    assert jnp.allclose(out, ref, atol=1e-5, rtol=1e-5)

    print("KERNEL_OK")
</pallas_src>

<mosaic_0001>
module attributes {stable_mosaic.version = 11 : i64} {
  func.func @time2vec_kernel(%arg0: i32, %arg1: memref<4x128xf32, #tpu.memory_space<vmem>>, %arg2: memref<8x1xf32, #tpu.memory_space<vmem>>, %arg3: memref<8x1xf32, #tpu.memory_space<vmem>>, %arg4: memref<4x8x128xf32, #tpu.memory_space<vmem>>) attributes {dimension_semantics = [#tpu.dimension_semantics<parallel>], iteration_bounds = array<i64: 1>, scalar_prefetch = 0 : i64, scratch_operands = 0 : i64, tpu.core_type = #tpu.core_type<tc>, window_params = [{transform_indices = @transform_0, window_bounds = array<i64: 4, 128>}, {pipeline_mode = #tpu.pipeline_mode<synchronous>, transform_indices = @transform_1, window_bounds = array<i64: 8, 1>}, {pipeline_mode = #tpu.pipeline_mode<synchronous>, transform_indices = @transform_2, window_bounds = array<i64: 8, 1>}, {transform_indices = @transform_3, window_bounds = array<i64: 4, 8, 128>}]} {
    %c0 = arith.constant 0 : index
    %c0_0 = arith.constant 0 : index
    %0 = vector.load %arg1[%c0, %c0_0] : memref<4x128xf32, #tpu.memory_space<vmem>>, vector<4x128xf32>
    %c0_1 = arith.constant 0 : index
    %c0_2 = arith.constant 0 : index
    %1 = vector.load %arg2[%c0_1, %c0_2] : memref<8x1xf32, #tpu.memory_space<vmem>>, vector<8x1xf32>
    %2 = vector.shape_cast %1 : vector<8x1xf32> to vector<1x8x1xf32>
    %c0_3 = arith.constant 0 : index
    %c0_4 = arith.constant 0 : index
    %3 = vector.load %arg3[%c0_3, %c0_4] : memref<8x1xf32, #tpu.memory_space<vmem>>, vector<8x1xf32>
    %4 = vector.shape_cast %3 : vector<8x1xf32> to vector<1x8x1xf32>
    %5 = vector.shape_cast %0 : vector<4x128xf32> to vector<4x1x128xf32>
    %6 = vector.broadcast %5 : vector<4x1x128xf32> to vector<4x8x128xf32>
    %7 = vector.broadcast %2 : vector<1x8x1xf32> to vector<4x8x128xf32>
    %8 = arith.mulf %6, %7 : vector<4x8x128xf32>
    %9 = vector.broadcast %4 : vector<1x8x1xf32> to vector<4x8x128xf32>
    %10 = arith.addf %8, %9 : vector<4x8x128xf32>
    %11 = tpu.iota {dimensions = array<i32: 1>} : vector<4x8x128xi32>
    %c0_i32 = arith.constant 0 : i32
    %12 = vector.broadcast %c0_i32 : i32 to vector<4x8x128xi32>
    %13 = arith.cmpi eq, %11, %12 : vector<4x8x128xi32>
    %14 = math.sin %10 : vector<4x8x128xf32>
    %15 = arith.select %13, %10, %14 : vector<4x8x128xi1>, vector<4x8x128xf32>
    %c0_5 = arith.constant 0 : index
    %c0_6 = arith.constant 0 : index
    %c0_7 = arith.constant 0 : index
    %16 = vector.load %arg4[%c0_5, %c0_6, %c0_7] : memref<4x8x128xf32, #tpu.memory_space<vmem>>, vector<4x8x128xf32>
    tpu.vector_store %arg4[%c0_5, %c0_6, %c0_7], %15 {strides = array<i32>} : memref<4x8x128xf32, #tpu.memory_space<vmem>>, vector<4x8x128xf32>,
    return
  }
  func.func @transform_0(%arg0: i32) -> (i32, i32) {
    %c0_i32 = arith.constant 0 : i32
    %c0_i32_0 = arith.constant 0 : i32
    return %arg0, %c0_i32 : i32, i32
  }
  func.func @transform_1(%arg0: i32) -> (i32, i32) {
    %c0_i32 = arith.constant 0 : i32
    %c0_i32_0 = arith.constant 0 : i32
    %c0_i32_1 = arith.constant 0 : i32
    return %c0_i32, %c0_i32_0 : i32, i32
  }
  func.func @transform_2(%arg0: i32) -> (i32, i32) {
    %c0_i32 = arith.constant 0 : i32
    %c0_i32_0 = arith.constant 0 : i32
    %c0_i32_1 = arith.constant 0 : i32
    return %c0_i32, %c0_i32_0 : i32, i32
  }
  func.func @transform_3(%arg0: i32) -> (i32, i32, i32) {
    %c0_i32 = arith.constant 0 : i32
    %c0_i32_0 = arith.constant 0 : i32
    %c0_i32_1 = arith.constant 0 : i32
    return %arg0, %c0_i32, %c0_i32_0 : i32, i32, i32
  }
}

</mosaic_0001>

<bundles_post_ra>
// kernel: tpu_custom_call.1
= control target key start
LH: loop header
LB: loop body
LE: loop exit
PB: predicated region body
PF: predicated region fallthrough
CT: control target
= control target key end

     0   :  { %s964_s0 = inlined_call_operand.vmem [shape: f32[4,128], index: 0, kind: input, shape index: {}]   ;;  %s965_s1 = inlined_call_operand.vmem [shape: f32[8,1], index: 1, kind: input, shape index: {}]   ;;  %s966_s2 = inlined_call_operand.vmem [shape: f32[8,1], index: 2, kind: input, shape index: {}]   ;;  %s967_s3 = inlined_call_operand.hbm [shape: f32[4,8,128], index: 3, kind: output, shape index: {}]  }
   0x1   :  { %v16_v0 = vld [vmem:[%s965_s1] sm:$0xff] }
   0x2   :  { %8 = vsyncpa [#allocation3], 0  ;;  %v607_v1 = vmov 0   ;;  %v17_v2 = vld [vmem:[%s966_s2] sm:$0xff]  ;;  %v608_v3 = vmov 1966171168   ;;  %v30_v5 = vlaneseq }
   0x3   :  { %568 = vset.pattern.permute.xlu0 %v607_v1  ;;  %v28_v4 = vunpack.c.l.s4 %v608_v3  ;;  %v524_v9 = vld.sshfl [vmem:[%s964_s0] sm:$0x33 pattern:$0x75316420]  ;;  %v609_v57 = vmov 683565275  }
   0x4   :  { %65 = vperm.xlu0 %568, %v16_v0   ;;  %v644_v7 = vshrl.u32 %v30_v5, 7  ;;  %v26_v11 = vcombine.high %v524_v9, %v524_v9  ;;  %v610_v61 = vmov 2475754826   ;;  %v611_v63 = vmov 2131351028   ;;  %s615_s0 = smov [#allocation2]  }
   0x5   :  { %v29_v6 = vunpack.c.0.s8 %v28_v4  ;;  %v612_v1 = vmov 2102212464   ;;  %v613_v3 = vmov 920167782   ;;  %s513_s1 = sshll.u32 %s615_s0, 4  ;;  %s514_s1 = int_to_ptr.vmem [resolvable:$true] %s513_s1 }
   0x6   :  { %v45_v12 = vsub.s32 0, %v644_v7  ;;  %s585_s2 = scalar_lea.vmem %s514_s1, 512  ;;  %p590_p1 = scmp.lt.s32.totalorder %s514_s1, %s514_s1 }
   0x7   :  { %v32_v8 = vsub.s32 %v29_v6, %v644_v7  ;;  %p586_p0 = scmp.ne.s32.totalorder %s514_s1, %s585_s2  ;;  %p591_p2 = scmp.lt.s32.totalorder %s585_s2, %s585_s2 }
   0x8   :  { %74 = vperm.xlu0 %568, %v17_v2  }
   0x9   :  { %v33_v10 = vrot.slane %v524_v9, %v32_v8  ;;  %v40_v14 = vrot.slane %v26_v11, %v32_v8  ;;  %v614_v11 = vmov 1326507024   ;;  %p592_p3 = por %p591_p2, %p590_p1 }
   0xb   :  { %v41_v13 = vcombine.high %v33_v10, %v33_v10  ;;  %v46_v15 = vrot.slane %v33_v10, %v45_v12  ;;  %v50_v16 = vrot.slane %v40_v14, %v45_v12  ;;  %v42_v26 = vcombine.high %v40_v14, %v40_v14  ;;  %p593_p4 = pnand %p592_p3, %p586_p0 }
   0xd   :  { %v54_v18 = vrot.slane %v41_v13, %v45_v12  ;;  %v58_v36 = vrot.slane %v42_v26, %v45_v12 }
  0x7f   :  { %v66_v17 = vpop.permute.xlu0 %65 }
  0x80   :  { %v68_v19 = vmul.f32 %v66_v17, %v46_v15  ;;  %v69_v20 = vmul.f32 %v66_v17, %v50_v16  ;;  %v70_v22 = vmul.f32 %v66_v17, %v54_v18  ;;  %v71_v46 = vmul.f32 %v66_v17, %v58_v36 }
  0x83   :  { %v75_v21 = vpop.permute.xlu0 %74 }
  0x84   :  { %v651_v23 = vadd.f32 %v75_v21, %v68_v19  ;;  %v653_v24 = vadd.f32 %v75_v21, %v69_v20  ;;  %v655_v25 = vadd.f32 %v75_v21, %v70_v22  ;;  %v667_v48 = vadd.f32 %v75_v21, %v71_v46 }
  0x86   :  { %v84_v27 = vand.u32 2147483647, %v651_v23  ;;  %v87_v28 = vand.u32 2139095040, %v651_v23  ;;  %v188_v29 = vand.u32 2147483647, %v653_v24  ;;  %v191_v30 = vand.u32 2139095040, %v653_v24 }
  0x87   :  { %v295_v35 = vand.u32 2139095040, %v655_v25  ;;  %v292_v44 = vand.u32 2147483647, %v655_v25  ;;  %vm86_vm13 = vcmp.lt.s32.totalorder %v651_v23, 0 }
  0x88   :  { %v88_v31 = vshrl.u32 %v87_v28, 23  ;;  %v91_v32 = vand.u32 8388607, %v84_v27  ;;  %v192_v33 = vshrl.u32 %v191_v30, 23  ;;  %v195_v34 = vand.u32 8388607, %v188_v29 }
  0x89   :  { %v296_v39 = vshrl.u32 %v295_v35, 23  ;;  %v675_v54 = vand.u32 8388607, %v292_v44  ;;  %vm780_vm14 = vcmp.le.f32.partialorder %v84_v27, 0.7853982 }
  0x8a   :  { %v525_v37 = vadd.s32 4294967169, %v88_v31  ;;  %v529_v38 = vadd.s32 4294967169, %v192_v33  ;;  %v92_v40 = vor.u32 8388608, %v91_v32  ;;  %v196_v42 = vor.u32 8388608, %v195_v34 }
  0x8b   :  { %v533_v45 = vadd.s32 4294967169, %v296_v39 }
  0x8c   :  { %v94_v41 = vadd.s32 1, %v525_v37  ;;  %v198_v43 = vadd.s32 1, %v529_v38  ;;  %v669_v52 = vshll.u32 %v92_v40, 8  ;;  %v671_v53 = vshll.u32 %v196_v42, 8 }
  0x8d   :  { %v677_v55 = vadd.s32 1, %v533_v45 }
  0x8e   :  { %vm95_vm0 = vcmp.gt.s32.totalorder %v94_v41, 0  ;;  %vm199_vm1 = vcmp.gt.s32.totalorder %v198_v43, 0 }
  0x8f   :  { %v96_v47 = vsel %vm95_vm0, %v94_v41, 0  ;;  %v200_v51 = vsel %vm199_vm1, %v198_v43, 0  ;;  %vm303_vm6 = vcmp.gt.s32.totalorder %v677_v55, 0 }
  0x90   :  { %v97_v49 = vshrl.u32 %v96_v47, 5  ;;  %v98_v50 = vand.u32 31, %v96_v47  ;;  %v680_v59 = vshrl.u32 %v200_v51, 5  ;;  %v202_v60 = vand.u32 31, %v200_v51 }
  0x92   :  { %v99_v56 = vsub.s32 32, %v98_v50  ;;  %v101_v58 = vshll.u32 %v609_v57, %v98_v50  ;;  %v104_v62 = vshll.u32 %v610_v61, %v98_v50  ;;  %v107_v0 = vshll.u32 %v611_v63, %v98_v50 }
  0x93   :  { %v110_v2 = vshll.u32 %v612_v1, %v98_v50  ;;  %v113_v4 = vshll.u32 %v613_v3, %v98_v50  ;;  %vm116_vm2 = vcmp.lt.s32.totalorder %v97_v49, 1  ;;  %vm117_vm3 = vcmp.lt.s32.totalorder %v97_v49, 2 }
  0x94   :  { %v102_v5 = vshrl.u32 %v610_v61, %v99_v56  ;;  %v105_v6 = vshrl.u32 %v611_v63, %v99_v56  ;;  %v108_v8 = vshrl.u32 %v612_v1, %v99_v56  ;;  %v100_v9 = vshrl.u32 %v609_v57, %v99_v56 }
  0x95   :  { %v111_v10 = vshrl.u32 %v613_v3, %v99_v56  ;;  %v114_v12 = vshrl.u32 %v614_v11, %v99_v56  ;;  %v203_v16 = vsub.s32 32, %v202_v60  ;;  %vm118_vm4 = vcmp.lt.s32.totalorder %v97_v49, 3 }
  0x96   :  { %v103_v13 = vor.u32 %v102_v5, %v101_v58  ;;  %v106_v14 = vor.u32 %v105_v6, %v104_v62  ;;  %v109_v15 = vor.u32 %v108_v8, %v107_v0  ;;  %vm119_vm5 = vcmp.lt.s32.totalorder %v97_v49, 4 }
  0x97   :  { %v112_v17 = vor.u32 %v111_v10, %v110_v2  ;;  %v115_v18 = vor.u32 %v114_v12, %v113_v4  ;;  %v205_v31 = vshll.u32 %v609_v57, %v202_v60  ;;  %v206_v34 = vshrl.u32 %v610_v61, %v203_v16 }
  0x98   :  { %v120_v19 = vsel %vm116_vm2, %v100_v9, %v103_v13  ;;  %v121_v20 = vsel %vm119_vm5, %v109_v15, 2102212464  ;;  %v124_v21 = vsel %vm116_vm2, %v103_v13, %v106_v14  ;;  %v128_v22 = vsel %vm116_vm2, %v106_v14, %v109_v15 }
  0x99   :  { %v122_v26 = vsel %vm118_vm4, %v106_v14, %v121_v20  ;;  %v125_v28 = vsel %vm119_vm5, %v112_v17, 920167782  ;;  %v129_v30 = vsel %vm119_vm5, %v115_v18, 1326507024  ;;  %v208_v35 = vshll.u32 %v610_v61, %v202_v60 }
  0x9a   :  { %v126_v32 = vsel %vm118_vm4, %v109_v15, %v125_v28  ;;  %v130_v33 = vsel %vm118_vm4, %v112_v17, %v129_v30  ;;  %v123_v36 = vsel %vm117_vm3, %v120_v19, %v122_v26  ;;  %v209_v39 = vshrl.u32 %v611_v63, %v203_v16 }
  0x9b   :  { %v127_v37 = vsel %vm117_vm3, %v124_v21, %v126_v32  ;;  %v131_v38 = vsel %vm117_vm3, %v128_v22, %v130_v33  ;;  %v207_v45 = vor.u32 %v206_v34, %v205_v31  ;;  %v211_v47 = vshll.u32 %v611_v63, %v202_v60 }
  0x9c   :  { %v704_v40 = vmul.u32.u64.low %v669_v52, %v131_v38  ;;  %v705_v41 = vmul.u32.u64.high %v669_v52, %v131_v38, %v704_v40  ;;  %v708_v42 = vmul.u32.u64.low %v669_v52, %v127_v37  ;;  %v709_v43 = vmul.u32.u64.high %v669_v52, %v127_v37, %v708_v42 }
  0x9d   :  { %v210_v46 = vor.u32 %v209_v39, %v208_v35  ;;  %v212_v50 = vshrl.u32 %v612_v1, %v203_v16  ;;  %v204_v49 = vshrl.u32 %v609_v57, %v203_v16  ;;  %v214_v51 = vshll.u32 %v612_v1, %v202_v60 }
  0x9e   :  { %v215_v56 = vshrl.u32 %v613_v3, %v203_v16  ;;  %v218_v58 = vshrl.u32 %v614_v11, %v203_v16  ;;  %v139_v62 = vmul.u32 %v669_v52, %v123_v36  ;;  %v217_v2 = vshll.u32 %v613_v3, %v202_v60 }
  0x9f   :  { %v213_v0 = vor.u32 %v212_v50, %v211_v47  ;;  %vm220_vm7 = vcmp.lt.s32.totalorder %v680_v59, 1  ;;  %vm141_vm8 = vc.u32 %v705_v41, %v708_v42  ;;  %v142_v4 = vadd.s32 1, %v709_v43 }
  0xa0   :  { %v216_v5 = vor.u32 %v215_v56, %v214_v51  ;;  %vm221_vm9 = vcmp.lt.s32.totalorder %v680_v59, 2  ;;  %v219_v6 = vor.u32 %v218_v58, %v217_v2  ;;  %vm222_vm10 = vcmp.lt.s32.totalorder %v680_v59, 3 }
  0xa1   :  { %vm223_vm11 = vcmp.lt.s32.totalorder %v680_v59, 4  ;;  %v228_v8 = vsel %vm220_vm7, %v207_v45, %v210_v46  ;;  %v143_v52 = vsel %vm141_vm8, %v142_v4, %v709_v43  ;;  %v232_v10 = vsel %vm220_vm7, %v210_v46, %v213_v0 }
  0xa2   :  { %v225_v9 = vsel %vm223_vm11, %v213_v0, 2102212464  ;;  %v229_v60 = vsel %vm223_vm11, %v216_v5, 920167782  ;;  %v144_v12 = vadd.s32 %v143_v52, %v139_v62  ;;  %v224_v13 = vsel %vm220_vm7, %v204_v49, %v207_v45 }
  0xa3   :  { %v230_v14 = vsel %vm222_vm10, %v213_v0, %v229_v60  ;;  %v233_v15 = vsel %vm223_vm11, %v219_v6, 1326507024  ;;  %v226_v16 = vsel %vm222_vm10, %v210_v46, %v225_v9  ;;  %v304_v19 = vsel %vm303_vm6, %v677_v55, 0 }
  0xa4   :  { %v231_v17 = vsel %vm221_vm9, %v228_v8, %v230_v14  ;;  %v234_v18 = vsel %vm222_vm10, %v216_v5, %v233_v15  ;;  %v145_v20 = vadd.s32 536870912, %v144_v12  ;;  %v227_v32 = vsel %vm221_vm9, %v224_v13, %v226_v16 }
  0xa5   :  { %v235_v21 = vsel %vm221_vm9, %v232_v10, %v234_v18  ;;  %v736_v22 = vmul.u32.u64.low %v671_v53, %v231_v17  ;;  %v737_v26 = vmul.u32.u64.high %v671_v53, %v231_v17, %v736_v22  ;;  %v306_v33 = vand.u32 31, %v304_v19 }
  0xa6   :  { %v741_v28 = vmul.u32.u64.low %v671_v53, %v235_v21  ;;  %v742_v30 = vmul.u32.u64.high %v671_v53, %v235_v21, %v741_v28  ;;  %v146_v31 = vshrl.u32 %v145_v20, 30  ;;  %v300_v55 = vor.u32 8388608, %v675_v54 }
  0xa7   :  { %v396_v34 = vand.u32 2147483647, %v667_v48  ;;  %v246_v36 = vadd.s32 1, %v737_v26  ;;  %v307_v37 = vsub.s32 32, %v306_v33  ;;  %v399_v38 = vand.u32 2139095040, %v667_v48 }
  0xa8   :  { %v147_v35 = vshll.u32 %v146_v31, 30  ;;  %v243_v39 = vmul.u32 %v671_v53, %v227_v32  ;;  %vm245_vm12 = vc.u32 %v742_v30, %v736_v22  ;;  %v758_v45 = vshll.u32 %v300_v55, 8 }
  0xa9   :  { %v247_v59 = vsel %vm245_vm12, %v246_v36, %v737_v26  ;;  %v310_v43 = vshrl.u32 %v610_v61, %v307_v37  ;;  %v762_v46 = vand.u32 8388607, %v396_v34  ;;  %v313_v47 = vshrl.u32 %v611_v63, %v307_v37 }
  0xaa   :  { %v753_v40 = vsub.s32 %v144_v12, %v147_v35  ;;  %v248_v54 = vadd.s32 %v247_v59, %v243_v39  ;;  %v316_v50 = vshrl.u32 %v612_v1, %v307_v37  ;;  %v400_v49 = vshrl.u32 %v399_v38, 23 }
  0xab   :  { %v170_v51 = vsub.s32 4, %v146_v31  ;;  %v767_v58 = vshrl.u32 %v304_v19, 5  ;;  %v309_v62 = vshll.u32 %v609_v57, %v306_v33  ;;  %v312_v2 = vshll.u32 %v610_v61, %v306_v33 }
  0xac   :  { %v150_v53 = vsub.s32 0, %v753_v40  ;;  %v249_v56 = vadd.s32 536870912, %v248_v54  ;;  %v315_v4 = vshll.u32 %v611_v63, %v306_v33  ;;  %v319_v5 = vshrl.u32 %v613_v3, %v307_v37 }
  0xad   :  { %v311_v8 = vor.u32 %v310_v43, %v309_v62  ;;  %v318_v52 = vshll.u32 %v612_v1, %v306_v33  ;;  %v322_v9 = vshrl.u32 %v614_v11, %v307_v37  ;;  %v314_v12 = vor.u32 %v313_v47, %v312_v2 }
  0xae   :  { %v526_v0 = vmin.u32 %v150_v53, %v753_v40  ;;  %v774_v6 = vshrl.u32 %v249_v56, 30  ;;  %v317_v13 = vor.u32 %v316_v50, %v315_v4  ;;  %v321_v14 = vshll.u32 %v613_v3, %v306_v33 }
  0xaf   :  { %v140_v15 = vadd.s32 %v708_v42, %v705_v41  ;;  %v320_v17 = vor.u32 %v319_v5, %v318_v52  ;;  %v537_v18 = vadd.s32 4294967169, %v400_v49  ;;  %vm324_vm15 = vcmp.lt.s32.totalorder %v767_v58, 1 }
  0xb0   :  { %v152_v10 = vclz %v526_v0  ;;  %v251_v16 = vshll.u32 %v774_v6, 30  ;;  %v323_v20 = vor.u32 %v322_v9, %v321_v14  ;;  %vm327_vm0 = vcmp.lt.s32.totalorder %v767_v58, 4 }
  0xb1   :  { %vm325_vm1 = vcmp.lt.s32.totalorder %v767_v58, 2  ;;  %vm326_vm2 = vcmp.lt.s32.totalorder %v767_v58, 3  ;;  %v333_v21 = vsel %vm327_vm0, %v320_v17, 920167782  ;;  %v171_v41 = vsel %vm86_vm13, %v170_v51, %v146_v31 }
  0xb2   :  { %v527_v19 = vadd.s32 4294967294, %v152_v10  ;;  %v790_v27 = vsub.s32 %v248_v54, %v251_v16  ;;  %v332_v42 = vsel %vm324_vm15, %v311_v8, %v314_v12  ;;  %v334_v26 = vsel %vm326_vm2, %v317_v13, %v333_v21 }
  0xb3   :  { %v308_v33 = vshrl.u32 %v609_v57, %v307_v37  ;;  %v336_v55 = vsel %vm324_vm15, %v314_v12, %v317_v13  ;;  %v329_v38 = vsel %vm327_vm0, %v317_v13, 2102212464  ;;  %v337_v31 = vsel %vm327_vm0, %v323_v20, 1326507024 }
  0xb4   :  { %vm528_vm3 = vcmp.lt.s32.totalorder %v527_v19, 0  ;;  %v254_v32 = vsub.s32 0, %v790_v27  ;;  %v335_v54 = vsel %vm325_vm1, %v332_v42, %v334_v26  ;;  %v338_v37 = vsel %vm326_vm2, %v320_v17, %v337_v31 }
  0xb5   :  { %v155_v28 = vsel %vm528_vm3, 0, %v527_v19  ;;  %v339_v47 = vsel %vm325_vm1, %v336_v55, %v338_v37  ;;  %v406_v50 = vadd.s32 1, %v537_v18  ;;  %v173_v49 = vsel %vm780_vm14, 0, %v171_v41 }
  0xb6   :  { %v156_v35 = vsub.s32 32, %v155_v28  ;;  %v160_v36 = vsub.s32 4294967266, %v155_v28  ;;  %v157_v39 = vshll.u32 %v753_v40, %v155_v28  ;;  %v530_v59 = vmin.u32 %v254_v32, %v790_v27 }
  0xb7   :  { %v328_v40 = vsel %vm324_vm15, %v308_v33, %v311_v8  ;;  %v330_v56 = vsel %vm326_vm2, %v314_v12, %v329_v38  ;;  %v825_v2 = vmul.u32.u64.low %v758_v45, %v339_v47  ;;  %v826_v4 = vmul.u32.u64.high %v758_v45, %v339_v47, %v825_v2 }
  0xb8   :  { %v158_v43 = vshrl.u32 %v140_v15, %v156_v35  ;;  %v161_v53 = vadd.s32 127, %v160_v36  ;;  %v256_v51 = vclz %v530_v59  ;;  %vm407_vm4 = vcmp.gt.s32.totalorder %v406_v50, 0 }
  0xb9   :  { %v829_v52 = vmul.u32.u64.low %v758_v45, %v335_v54  ;;  %v830_v9 = vmul.u32.u64.high %v758_v45, %v335_v54, %v829_v52  ;;  %v244_v8 = vadd.s32 %v736_v22, %v742_v30  ;;  %v404_v13 = vor.u32 8388608, %v762_v46 }
  0xba   :  { %v159_v62 = vor.u32 %v158_v43, %v157_v39  ;;  %v162_v0 = vshll.u32 %v161_v53, 23  ;;  %v531_v5 = vadd.s32 4294967294, %v256_v51  ;;  %v408_v12 = vsel %vm407_vm4, %v406_v50, 0 }
  0xbb   :  { %v177_v14 = vadd.s32 3, %v173_v49  ;;  %v331_v15 = vsel %vm325_vm1, %v328_v40, %v330_v56  ;;  %v410_v16 = vand.u32 31, %v408_v12  ;;  %vm349_vm6 = vc.u32 %v826_v4, %v829_v52 }
  0xbc   :  { %v163_v10 = vor.u32 4788187, %v162_v0  ;;  %vm532_vm5 = vcmp.lt.s32.totalorder %v531_v5, 0  ;;  %v166_v18 = vcvt.s32.f32 %v159_v62  ;;  %v274_v41 = vsub.s32 4, %v774_v6 }
  0xbd   :  { %v259_v19 = vsel %vm532_vm5, 0, %v531_v5  ;;  %v350_v22 = vadd.s32 1, %v830_v9  ;;  %v347_v46 = vmul.u32 %v758_v45, %v331_v15  ;;  %v843_v42 = vshrl.u32 %v408_v12, 5 }
  0xbe   :  { %v164_v17 = vand.u32 2147483647, %v163_v10  ;;  %v260_v20 = vsub.s32 32, %v259_v19  ;;  %v264_v21 = vsub.s32 4294967266, %v259_v19  ;;  %v411_v58 = vsub.s32 32, %v410_v16 }
  0xbf   :  { %v261_v26 = vshll.u32 %v790_v27, %v259_v19  ;;  %v351_v33 = vsel %vm349_vm6, %v350_v22, %v830_v9  ;;  %v413_v36 = vshll.u32 %v609_v57, %v410_v16  ;;  %v416_v59 = vshll.u32 %v610_v61, %v410_v16 }
  0xc0   :  { %v167_v30 = vmul.f32 %v166_v18, %v164_v17  ;;  %v262_v28 = vshrl.u32 %v244_v8, %v260_v20  ;;  %v265_v32 = vadd.s32 127, %v264_v21  ;;  %v352_v35 = vadd.s32 %v351_v33, %v347_v46 }
  0xc1   :  { %v414_v38 = vshrl.u32 %v610_v61, %v411_v58  ;;  %v417_v45 = vshrl.u32 %v611_v63, %v411_v58  ;;  %v419_v37 = vshll.u32 %v611_v63, %v410_v16  ;;  %v420_v43 = vshrl.u32 %v612_v1, %v411_v58 }
  0xc2   :  { %v168_v55 = vxor.u32 2147483648, %v167_v30  ;;  %v263_v31 = vor.u32 %v262_v28, %v261_v26  ;;  %v266_v39 = vshll.u32 %v265_v32, 23  ;;  %v353_v27 = vadd.s32 536870912, %v352_v35 }
  0xc3   :  { %v415_v50 = vor.u32 %v414_v38, %v413_v36  ;;  %v422_v49 = vshll.u32 %v612_v1, %v410_v16  ;;  %v423_v40 = vshrl.u32 %v613_v3, %v411_v58  ;;  %v418_v62 = vor.u32 %v417_v45, %v416_v59 }
  0xc4   :  { %v169_v54 = vsel %vm86_vm13, %v168_v55, %v167_v30  ;;  %v267_v47 = vor.u32 4788187, %v266_v39  ;;  %v270_v61 = vcvt.s32.f32 %v263_v31  ;;  %v859_v51 = vshrl.u32 %v353_v27, 30 }
  0xc5   :  { %v172_v53 = vsel %vm780_vm14, %v651_v23, %v169_v54  ;;  %v426_v63 = vshrl.u32 %v614_v11, %v411_v58  ;;  %vm865_vm7 = vcmp.le.f32.partialorder %v188_v29, 0.7853982  ;;  %vm190_vm8 = vcmp.lt.s32.totalorder %v653_v24, 0 }
  0xc6   :  { %569 = vcosq.f32 %v172_v53  ;;  %v268_v56 = vand.u32 2147483647, %v267_v47  ;;  %v355_v1 = vshll.u32 %v859_v51, 30  ;;  %v424_v0 = vor.u32 %v423_v40, %v422_v49 }
  0xc7   :  { %571 = vsinq.f32 %v172_v53  ;;  %v178_v2 = vand.u32 3, %v177_v14  ;;  %v421_v9 = vor.u32 %v420_v43, %v419_v37  ;;  %v425_v10 = vshll.u32 %v613_v3, %v410_v16 }
  0xc8   :  { %v271_v5 = vmul.f32 %v270_v61, %v268_v56  ;;  %v275_v11 = vsel %vm190_vm8, %v274_v41, %v774_v6  ;;  %v875_v8 = vsub.s32 %v352_v35, %v355_v1  ;;  %vm428_vm9 = vcmp.lt.s32.totalorder %v843_v42, 1 }
  0xc9   :  { %v444_v29 = vshll.u32 %v404_v13, 8  ;;  %v427_v15 = vor.u32 %v426_v63, %v425_v10  ;;  %vm431_vm10 = vcmp.lt.s32.totalorder %v843_v42, 4  ;;  %v436_v14 = vsel %vm428_vm9, %v415_v50, %v418_v62 }
  0xca   :  { %v272_v12 = vxor.u32 2147483648, %v271_v5  ;;  %v358_v17 = vsub.s32 0, %v875_v8  ;;  %v412_v3 = vshrl.u32 %v609_v57, %v411_v58  ;;  %vm430_vm11 = vcmp.lt.s32.totalorder %v843_v42, 3 }
  0xcb   :  { %v437_v16 = vsel %vm431_vm10, %v424_v0, 920167782  ;;  %vm429_vm12 = vcmp.lt.s32.totalorder %v843_v42, 2  ;;  %v433_v13 = vsel %vm431_vm10, %v421_v9, 2102212464  ;;  %v440_v21 = vsel %vm428_vm9, %v418_v62, %v421_v9 }
  0xcc   :  { %v273_v6 = vsel %vm190_vm8, %v272_v12, %v271_v5  ;;  %v438_v18 = vsel %vm430_vm11, %v421_v9, %v437_v16  ;;  %v534_v20 = vmin.u32 %v358_v17, %v875_v8  ;;  %v441_v41 = vsel %vm431_vm10, %v427_v15, 1326507024 }
  0xcd   :  { %v276_v19 = vsel %vm865_vm7, %v653_v24, %v273_v6  ;;  %v439_v57 = vsel %vm429_vm12, %v436_v14, %v438_v18  ;;  %vm83_vm13 = vcmp.eq.s32.totalorder %v644_v7, 0  ;;  %v432_v58 = vsel %vm428_vm9, %v412_v3, %v415_v50 }
  0xce   :  { %573 = vcosq.f32 %v276_v19  ;;  %v897_v22 = vmul.u32.u64.low %v444_v29, %v439_v57  ;;  %v898_v30 = vmul.u32.u64.high %v444_v29, %v439_v57, %v897_v22  ;;  %v360_v46 = vclz %v534_v20 }
  0xcf   :  { %575 = vsinq.f32 %v276_v19  ;;  %v434_v26 = vsel %vm430_vm11, %v418_v62, %v433_v13  ;;  %v442_v28 = vsel %vm430_vm11, %v424_v0, %v441_v41  ;;  %vm176_vm14 = vweird.f32 %v651_v23 }
  0xd0   :  { %v277_v32 = vsel %vm865_vm7, 0, %v275_v11  ;;  %v535_v33 = vadd.s32 4294967294, %v360_v46  ;;  %v443_v55 = vsel %vm429_vm12, %v440_v21, %v442_v28  ;;  %vm179_vm15 = vcmp.lt.s32.totalorder %v178_v2, 2 }
  0xd1   :  { %vm180_vm0 = vcmp.eq.s32.totalorder %v178_v2, 0  ;;  %v913_v36 = vmul.u32.u64.low %v444_v29, %v443_v55  ;;  %v914_v38 = vmul.u32.u64.high %v444_v29, %v443_v55, %v913_v36  ;;  %v435_v59 = vsel %vm429_vm12, %v432_v58, %v434_v26 }
  0xd2   :  { %vm536_vm1 = vcmp.lt.s32.totalorder %v535_v33, 0  ;;  %v454_v45 = vadd.s32 1, %v898_v30  ;;  %vm183_vm2 = vcmp.eq.s32.totalorder %v178_v2, 2  ;;  %v281_v27 = vadd.s32 3, %v277_v32 }
  0xd3   :  { %v570_v35 = vpop.eup %569  ;;  %v363_v37 = vsel %vm536_vm1, 0, %v535_v33  ;;  %v348_v53 = vadd.s32 %v829_v52, %v826_v4  ;;  %v451_v40 = vmul.u32 %v444_v29, %v435_v59  ;;  %vm453_vm3 = vc.u32 %v914_v38, %v897_v22 }
  0xd4   :  { %v572_v31 = vpop.eup %571  ;;  %v184_v39 = vxor.u32 2147483648, %v570_v35  ;;  %v364_v47 = vsub.s32 32, %v363_v37  ;;  %v368_v50 = vsub.s32 4294967266, %v363_v37  ;;  %v365_v61 = vshll.u32 %v875_v8, %v363_v37 }
  0xd5   :  { %v181_v54 = vxor.u32 2147483648, %v572_v31  ;;  %v455_v63 = vsel %vm453_vm3, %v454_v45, %v898_v30  ;;  %v282_v52 = vand.u32 3, %v281_v27  ;;  %vm280_vm7 = vweird.f32 %v653_v24 }
  0xd6   :  { %v185_v43 = vsel %vm183_vm2, %v184_v39, %v572_v31  ;;  %v366_v56 = vshrl.u32 %v348_v53, %v364_v47  ;;  %v369_v62 = vadd.s32 127, %v368_v50  ;;  %v456_v4 = vadd.s32 %v455_v63, %v451_v40 }
  0xd7   :  { %v182_v49 = vsel %vm180_vm0, %v570_v35, %v181_v54  ;;  %vm287_vm4 = vcmp.eq.s32.totalorder %v282_v52, 2  ;;  %vm284_vm5 = vcmp.eq.s32.totalorder %v282_v52, 0  ;;  %vm283_vm6 = vcmp.lt.s32.totalorder %v282_v52, 2 }
  0xd8   :  { %v186_v42 = vsel %vm179_vm15, %v182_v49, %v185_v43  ;;  %v367_v1 = vor.u32 %v366_v56, %v365_v61  ;;  %v370_v0 = vshll.u32 %v369_v62, 23  ;;  %v457_v9 = vadd.s32 536870912, %v456_v4 }
  0xd9   :  { %v187_v60 = vsel %vm176_vm14, nan, %v186_v42  ;;  %vm294_vm8 = vcmp.lt.s32.totalorder %v655_v25, 0  ;;  %v378_v20 = vsub.s32 4, %v859_v51  ;;  %vm293_vm9 = vcmp.le.f32.partialorder %v292_v44, 0.7853982 }
  0xda   :  { %v500_v5 = vsel %vm83_vm13, %v651_v23, %v187_v60  ;;  %v371_v2 = vor.u32 4788187, %v370_v0  ;;  %v932_v29 = vshrl.u32 %v457_v9, 30  ;;  %v374_v14 = vcvt.s32.f32 %v367_v1 }
  0xdb   :  { %504 = vst [vmem:[#allocation2] sm:$0xff] %v500_v5  ;;  %v574_v10 = vpop.eup %573  ;;  %v379_v58 = vsel %vm294_vm8, %v378_v20, %v859_v51  ;;  %vm384_vm15 = vweird.f32 %v655_v25  ;;  %vm398_vm0 = vcmp.lt.s32.totalorder %v667_v48, 0  ;;  %vm397_vm1 = vcmp.le.f32.partialorder %v396_v34, 0.7853982 }
  0xdc   :  { %v576_v11 = vpop.eup %575  ;;  %v288_v8 = vxor.u32 2147483648, %v574_v10  ;;  %v372_v15 = vand.u32 2147483647, %v371_v2  ;;  %v459_v3 = vshll.u32 %v932_v29, 30  ;;  %v381_v32 = vsel %vm293_vm9, 0, %v379_v58 }
  0xdd   :  { %v285_v12 = vxor.u32 2147483648, %v576_v11  ;;  %v385_v55 = vadd.s32 3, %v381_v32  ;;  %v482_v56 = vsub.s32 4, %v932_v29 }
  0xde   :  { %v289_v17 = vsel %vm287_vm4, %v288_v8, %v576_v11  ;;  %v375_v6 = vmul.f32 %v374_v14, %v372_v15  ;;  %v460_v13 = vsub.s32 %v456_v4, %v459_v3 }
  0xdf   :  { %v286_v16 = vsel %vm284_vm5, %v574_v10, %v285_v12  ;;  %v386_v59 = vand.u32 3, %v385_v55  ;;  %v483_v4 = vsel %vm398_vm0, %v482_v56, %v932_v29  ;;  %vm488_vm5 = vweird.f32 %v667_v48 }
  0xe0   :  { %v290_v23 = vsel %vm283_vm6, %v286_v16, %v289_v17  ;;  %v376_v19 = vxor.u32 2147483648, %v375_v6  ;;  %v462_v57 = vsub.s32 0, %v460_v13  ;;  %v485_v52 = vsel %vm397_vm1, 0, %v483_v4 }
  0xe1   :  { %v291_v18 = vsel %vm280_vm7, nan, %v290_v23  ;;  %vm391_vm11 = vcmp.eq.s32.totalorder %v386_v59, 2  ;;  %vm388_vm12 = vcmp.eq.s32.totalorder %v386_v59, 0  ;;  %vm387_vm14 = vcmp.lt.s32.totalorder %v386_v59, 2 }
  0xe2   :  { %v501_v21 = vsel %vm83_vm13, %v653_v24, %v291_v18  ;;  %v377_v41 = vsel %vm294_vm8, %v376_v19, %v375_v6  ;;  %v538_v46 = vmin.u32 %v462_v57, %v460_v13  ;;  %v452_v24 = vadd.s32 %v897_v22, %v914_v38 }
  0xe3   :  { %505 = vst [vmem:[#allocation2 + $0x8] sm:$0xff] %v501_v21  ;;  %v380_v30 = vsel %vm293_vm9, %v655_v25, %v377_v41  ;;  %v489_v1 = vadd.s32 3, %v485_v52 }
  0xe4   :  { %577 = vcosq.f32 %v380_v30  ;;  %v464_v26 = vclz %v538_v46 }
  0xe5   :  { %579 = vsinq.f32 %v380_v30  ;;  %v490_v0 = vand.u32 3, %v489_v1 }
  0xe6   :  { %v539_v28 = vadd.s32 4294967294, %v464_v26 }
  0xe7   :  { %vm495_vm2 = vcmp.eq.s32.totalorder %v490_v0, 2  ;;  %vm492_vm3 = vcmp.eq.s32.totalorder %v490_v0, 0  ;;  %vm491_vm4 = vcmp.lt.s32.totalorder %v490_v0, 2 }
  0xe8   :  { %vm540_vm10 = vcmp.lt.s32.totalorder %v539_v28, 0 }
  0xe9   :  { %v467_v33 = vsel %vm540_vm10, 0, %v539_v28 }
  0xea   :  { %v468_v35 = vsub.s32 32, %v467_v33  ;;  %v472_v44 = vsub.s32 4294967266, %v467_v33  ;;  %v469_v36 = vshll.u32 %v460_v13, %v467_v33 }
  0xec   :  { %v470_v31 = vshrl.u32 %v452_v24, %v468_v35  ;;  %v473_v39 = vadd.s32 127, %v472_v44 }
  0xee   :  { %v471_v45 = vor.u32 %v470_v31, %v469_v36  ;;  %v474_v54 = vshll.u32 %v473_v39, 23 }
  0xf0   :  { %v475_v51 = vor.u32 4788187, %v474_v54  ;;  %v478_v50 = vcvt.s32.f32 %v471_v45 }
  0xf1   :  { %v578_v27 = vpop.eup %577 }
  0xf2   :  { %v580_v37 = vpop.eup %579  ;;  %v392_v43 = vxor.u32 2147483648, %v578_v27  ;;  %v476_v47 = vand.u32 2147483647, %v475_v51 }
  0xf3   :  { %v389_v53 = vxor.u32 2147483648, %v580_v37 }
  0xf4   :  { %v393_v49 = vsel %vm391_vm11, %v392_v43, %v580_v37  ;;  %v479_v38 = vmul.f32 %v478_v50, %v476_v47 }
  0xf5   :  { %v390_v22 = vsel %vm388_vm12, %v578_v27, %v389_v53 }
  0xf6   :  { %v394_v61 = vsel %vm387_vm14, %v390_v22, %v393_v49  ;;  %v480_v42 = vxor.u32 2147483648, %v479_v38 }
  0xf7   :  { %v395_v40 = vsel %vm384_vm15, nan, %v394_v61 }
  0xf8   :  { %v502_v62 = vsel %vm83_vm13, %v655_v25, %v395_v40  ;;  %v481_v63 = vsel %vm398_vm0, %v480_v42, %v479_v38 }
  0xf9   :  { %506 = vst [vmem:[#allocation2 + $0x10] sm:$0xff] %v502_v62  ;;  %v484_v60 = vsel %vm397_vm1, %v667_v48, %v481_v63 }
  0xfa   :  { %581 = vcosq.f32 %v484_v60 }
  0xfb   :  { %583 = vsinq.f32 %v484_v60 }
 0x107   :  { %v582_v5 = vpop.eup %581 }
 0x108   :  { %v584_v9 = vpop.eup %583  ;;  %v496_v10 = vxor.u32 2147483648, %v582_v5 }
 0x109   :  { %v493_v2 = vxor.u32 2147483648, %v584_v9 }
 0x10a   :  { %v497_v25 = vsel %vm495_vm2, %v496_v10, %v584_v9 }
 0x10b   :  { %v494_v34 = vsel %vm492_vm3, %v582_v5, %v493_v2 }
 0x10c   :  { %v498_v11 = vsel %vm491_vm4, %v494_v34, %v497_v25 }
 0x10d   :  { %v499_v8 = vsel %vm488_vm5, nan, %v498_v11 }
 0x10e   :  { %v503_v29 = vsel %vm83_vm13, %v667_v48, %v499_v8 }
 0x10f   :  { %507 = vst [vmem:[#allocation2 + $0x18] sm:$0xff] %v503_v29 }
 0x110   :  { %596 = shalt.err (!%p593_p4)
}
 0x111   :  { %s616_s18 = smov 128   ;;  %s617_s19 = smov 8  }
 0x112   :  { %519 = dma.vmem_to_hbm [thread:$0]  %s514_s1, 512, %s967_s3, [#allocation3], %s616_s18, %s616_s18, %s617_s19  }
 0x113   :  { %605 = dma.done.wait [#allocation3], 512  }
 0x114   :  { %606 = vsyncadd [#allocation3], 4294966784 }
 0x115   :  { %523 = vsyncpa [#allocation3], 1 }

</bundles_post_ra>
